<compile_context>
chip_gen: v5e
topology: v5e:2x2
jax: 0.10.0
libtpu: 0.0.40
codegen_flags: <defaults>
</compile_context>

<pallas_src>
import functools
import math

import jax
import jax.numpy as jnp
from jax.experimental import pallas as pl
from jax.experimental.pallas import tpu as pltpu


def _gaussian_taps(window_size: int, sigma: float):
    """Flattened 2D Gaussian window (row-major (kh, kw), sums to 1) as floats."""
    g = [math.exp(-((x - window_size // 2) ** 2) / (2.0 * sigma ** 2))
         for x in range(window_size)]
    s = sum(g)
    g = [v / s for v in g]
    return tuple(gi * gj for gi in g for gj in g)


# --------------------------------------------------------------------------- #
# Kernel
# --------------------------------------------------------------------------- #
def _s3im_kernel(w_ref, b_ref, o_ref, *, k2: int):
    """Partial SSIM sum for one lane-tile of conv-output pixels.

    w_ref: (K2, 1)        f32  -- flattened 2D Gaussian window (input, not a
                                  captured constant)
    b_ref: (2*K2, TILE_M) bf16 -- stacked [src; tar] window taps; taps on the
                                  sublane axis, conv-output pixels on lanes
    o_ref: (8, 128)       f32  -- this tile's partial SSIM sum, splatted
    """
    b = b_ref[...].astype(jnp.float32)        # bf16 on the wire, f32 compute
    b1 = b[:k2, :]                            # src taps
    b2 = b[k2:, :]                            # tar taps
    w = w_ref[...]                            # (K2, 1), broadcasts across lanes

    # Fold the Gaussian weights once: 5 big multiplies instead of 8.
    b1w = b1 * w
    b2w = b2 * w
    # Depthwise conv at stride == kernel_size == weighted sublane reduction.
    mu1 = jnp.sum(b1w, axis=0, keepdims=True)          # (1, TILE_M)
    mu2 = jnp.sum(b2w, axis=0, keepdims=True)
    e11 = jnp.sum(b1w * b1, axis=0, keepdims=True)
    e22 = jnp.sum(b2w * b2, axis=0, keepdims=True)
    e12 = jnp.sum(b1w * b2, axis=0, keepdims=True)

    mu1_sq = mu1 * mu1
    mu2_sq = mu2 * mu2
    mu1_mu2 = mu1 * mu2
    # E[x^2] - mu^2 can go slightly negative from f32 cancellation (same as the
    # PyTorch reference); harmless since C2 keeps the denominator positive.
    sigma1_sq = e11 - mu1_sq
    sigma2_sq = e22 - mu2_sq
    sigma12 = e12 - mu1_mu2

    c1 = 0.01 ** 2
    c2 = 0.03 ** 2
    num = (2.0 * mu1_mu2 + c1) * (2.0 * sigma12 + c2)
    den = (mu1_sq + mu2_sq + c1) * (sigma1_sq + sigma2_sq + c2)
    # Divide on the EUP slot; frees VALU.  ~1e-4 relative shift, fine for a
    # stochastic loss.
    ssim_map = num * pl.reciprocal(den, approx=True)

    # No lane mask: zero-padded lanes evaluate to SSIM == 1 and are subtracted
    # on the host, keeping the inner loop purely streaming.
    psum = jnp.sum(ssim_map, keepdims=True)             # (1, 1)
    o_ref[...] = jnp.broadcast_to(psum, o_ref.shape)    # lane-dense (8,128) out


# --------------------------------------------------------------------------- #
# Wrapper
# --------------------------------------------------------------------------- #
def _make_res_index(key, n: int, repeat_time: int):
    """Identity indices first, then (repeat_time-1) random permutations."""
    idx_list = [jnp.arange(n, dtype=jnp.int32)]
    for _ in range(1, repeat_time):
        key, sub = jax.random.split(key)
        idx_list.append(jax.random.permutation(sub, n).astype(jnp.int32))
    return jnp.concatenate(idx_list, axis=0)


def _gather_taps(vec, res_index, *, h, w_tot, kernel_size, stride, pad,
                 h_out, w_out):
    """Window taps gathered directly from the raw (N, C) ray vector.

    Fuses stochastic permutation gather + NCHW patch assembly + zero padding +
    non-overlapping block extraction into a single gather; the coordinate math
    is iota arithmetic that XLA fuses into it.  Returns
    (kernel_size**2, h_out*w_out*C) with taps on the leading (sublane) axis.
    Lane order is (oh, ow, c) — irrelevant, since only the mean is taken.
    """
    ks = kernel_size
    kh = jnp.arange(ks, dtype=jnp.int32)[:, None, None, None]
    kw = jnp.arange(ks, dtype=jnp.int32)[None, :, None, None]
    oh = jnp.arange(h_out, dtype=jnp.int32)[None, None, :, None]
    ow = jnp.arange(w_out, dtype=jnp.int32)[None, None, None, :]
    y = stride * oh + kh - pad                 # row in un-padded virtual patch
    x = stride * ow + kw - pad                 # col in un-padded virtual patch
    valid = (y >= 0) & (y < h) & (x >= 0) & (x < w_tot)   # (ks,ks,h_out,w_out)
    flat = jnp.clip(y, 0, h - 1) * w_tot + jnp.clip(x, 0, w_tot - 1)
    rays = res_index[flat]                     # virtual-patch pixel -> ray id
    taps = jnp.where(valid[..., None], vec[rays], 0.0)    # (ks,ks,ho,wo,C)
    return taps.reshape(ks * ks, -1)


@functools.partial(
    jax.jit,
    static_argnames=("kernel_size", "stride", "repeat_time", "patch_height",
                     "patch_width", "tile_m_target"))
def s3im_loss(src_vec, tar_vec, key, *, kernel_size=4, stride=4, repeat_time=10,
              patch_height=64, patch_width=64, tile_m_target=8192):
    """JAX/Pallas equivalent of S3IM.forward(src_vec, tar_vec)."""
    assert stride == kernel_size, (
        "non-overlapping block decomposition requires stride == kernel_size")

    n, c = tar_vec.shape
    assert src_vec.shape == tar_vec.shape
    assert n == patch_height * patch_width

    h = patch_height
    w_tot = patch_width * repeat_time
    assert h % stride == 0 and w_tot % stride == 0
    pad = kernel_size // 2
    h_out = h // stride + 1
    w_out = w_tot // stride + 1
    k2 = kernel_size * kernel_size
    m = c * h_out * w_out                      # conv-output pixels

    # Stochastic re-shuffle indices.
    res_index = _make_res_index(key, n, repeat_time)

    # Fused gather + block extraction, bf16 on the wire (f32 compute in-kernel).
    src_b = src_vec.astype(jnp.bfloat16)
    tar_b = tar_vec.astype(jnp.bfloat16)
    kw = dict(h=h, w_tot=w_tot, kernel_size=kernel_size, stride=stride,
              pad=pad, h_out=h_out, w_out=w_out)
    b_src = _gather_taps(src_b, res_index, **kw)
    b_tar = _gather_taps(tar_b, res_index, **kw)

    # Lane tiling: few big tiles; always >= 2 and even so v7x uses both TCs.
    num_tiles = max(2, -(-m // tile_m_target))
    num_tiles += num_tiles % 2
    per_tile = -(-m // num_tiles)
    tile_m = ((per_tile + 127) // 128) * 128
    m_pad = tile_m * num_tiles

    # One stacked input => one DMA per grid step.
    stacked = jnp.concatenate([b_src, b_tar], axis=0)          # (2*K2, M) bf16
    stacked = jnp.pad(stacked, ((0, 0), (0, m_pad - m)))

    window = jnp.asarray(_gaussian_taps(kernel_size, 1.5),
                         dtype=jnp.float32).reshape(k2, 1)

    partial_sums = pl.pallas_call(
        functools.partial(_s3im_kernel, k2=k2),
        out_shape=jax.ShapeDtypeStruct((num_tiles * 8, 128), jnp.float32),
        grid=(num_tiles,),
        in_specs=[
            pl.BlockSpec((k2, 1), lambda i: (0, 0)),            # Gaussian window
            pl.BlockSpec((2 * k2, tile_m), lambda i: (0, i)),   # stacked taps
        ],
        out_specs=pl.BlockSpec((8, 128), lambda i: (i, 0)),
        compiler_params=pltpu.CompilerParams(
            dimension_semantics=("parallel",)),
    )(window, stacked)

    total = jnp.sum(partial_sums[::8, 0])
    # Each zero-padded lane contributes exactly SSIM == 1; correct on the host
    # instead of masking inside the kernel.
    mean_ssim = (total - float(m_pad - m)) / float(m)
    return 1.0 - mean_ssim


# --------------------------------------------------------------------------- #
# Pure-JAX f32 reference (mirrors the PyTorch path) for a sanity check.
# --------------------------------------------------------------------------- #
def _s3im_reference(src_vec, tar_vec, res_index, *, kernel_size, stride,
                    repeat_time, patch_height, patch_width):
    n, c = tar_vec.shape
    h = patch_height
    w_tot = patch_width * repeat_time
    pad = kernel_size // 2
    h_out = h // stride + 1
    w_out = w_tot // stride + 1
    k2 = kernel_size * kernel_size
    window = jnp.asarray(_gaussian_taps(kernel_size, 1.5),
                         jnp.float32).reshape(k2, 1, 1, 1)

    def to_blocks(vec):
        patch = vec[res_index].T.reshape(c, h, w_tot).astype(jnp.float32)
        p = jnp.pad(patch, ((0, 0), (pad, pad), (pad, pad)))
        b = p.reshape(c, h_out, kernel_size, w_out, kernel_size)
        return b.transpose(2, 4, 0, 1, 3).reshape(k2, c, h_out, w_out)

    b1, b2 = to_blocks(src_vec), to_blocks(tar_vec)
    mu1 = jnp.sum(b1 * window, axis=0)
    mu2 = jnp.sum(b2 * window, axis=0)
    e11 = jnp.sum(b1 * b1 * window, axis=0)
    e22 = jnp.sum(b2 * b2 * window, axis=0)
    e12 = jnp.sum(b1 * b2 * window, axis=0)
    mu1_sq, mu2_sq, mu1_mu2 = mu1 * mu1, mu2 * mu2, mu1 * mu2
    s1, s2, s12 = e11 - mu1_sq, e22 - mu2_sq, e12 - mu1_mu2
    c1, c2 = 0.01 ** 2, 0.03 ** 2
    ssim_map = ((2 * mu1_mu2 + c1) * (2 * s12 + c2)) / (
        (mu1_sq + mu2_sq + c1) * (s1 + s2 + c2))
    return 1.0 - jnp.mean(ssim_map)


if __name__ == "__main__":
    # Small but representative config: 16x16 virtual patch, 2 repeats.
    patch_height = 16
    patch_width = 16
    repeat_time = 2
    n_rays = patch_height * patch_width  # 256

    key = jax.random.PRNGKey(0)
    k_src, k_tar, k_perm = jax.random.split(key, 3)
    src_vec = jax.random.uniform(k_src, (n_rays, 3), dtype=jnp.float32)
    tar_vec = jax.random.uniform(k_tar, (n_rays, 3), dtype=jnp.float32)

    loss = s3im_loss(
        src_vec, tar_vec, k_perm,
        kernel_size=4, stride=4, repeat_time=repeat_time,
        patch_height=patch_height, patch_width=patch_width,
    )
    loss = jax.block_until_ready(loss)

    # Sanity check vs the f32 reference (loose: kernel uses bf16 inputs + EUP
    # approx reciprocal).
    res_index = _make_res_index(k_perm, n_rays, repeat_time)
    ref = _s3im_reference(src_vec, tar_vec, res_index, kernel_size=4, stride=4,
                          repeat_time=repeat_time, patch_height=patch_height,
                          patch_width=patch_width)
    assert jnp.isfinite(loss)
    assert abs(float(loss) - float(ref)) < 5e-2, (float(loss), float(ref))
    print("KERNEL_OK")
</pallas_src>

<mosaic_0001>
module attributes {stable_mosaic.version = 11 : i64} {
  func.func @_s3im_kernel(%arg0: i32, %arg1: memref<16x1xf32, #tpu.memory_space<vmem>>, %arg2: memref<32x128xbf16, #tpu.memory_space<vmem>>, %arg3: memref<8x128xf32, #tpu.memory_space<vmem>>) attributes {dimension_semantics = [#tpu.dimension_semantics<parallel>], iteration_bounds = array<i64: 2>, scalar_prefetch = 0 : i64, scratch_operands = 0 : i64, tpu.core_type = #tpu.core_type<tc>, window_params = [{pipeline_mode = #tpu.pipeline_mode<synchronous>, transform_indices = @transform_0, window_bounds = array<i64: 16, 1>}, {transform_indices = @transform_1, window_bounds = array<i64: 32, 128>}, {transform_indices = @transform_2, window_bounds = array<i64: 8, 128>}]} {
    %c0 = arith.constant 0 : index
    %c0_0 = arith.constant 0 : index
    %0 = vector.load %arg2[%c0, %c0_0] : memref<32x128xbf16, #tpu.memory_space<vmem>>, vector<32x128xbf16>
    %1 = arith.extf %0 : vector<32x128xbf16> to vector<32x128xf32>
    %2 = vector.extract_strided_slice %1 {offsets = [0, 0], sizes = [16, 128], strides = [1, 1]} : vector<32x128xf32> to vector<16x128xf32>
    %3 = vector.extract_strided_slice %1 {offsets = [16, 0], sizes = [16, 128], strides = [1, 1]} : vector<32x128xf32> to vector<16x128xf32>
    %c0_1 = arith.constant 0 : index
    %c0_2 = arith.constant 0 : index
    %4 = vector.load %arg1[%c0_1, %c0_2] : memref<16x1xf32, #tpu.memory_space<vmem>>, vector<16x1xf32>
    %5 = vector.broadcast %4 : vector<16x1xf32> to vector<16x128xf32>
    %6 = arith.mulf %2, %5 : vector<16x128xf32>
    %7 = vector.broadcast %4 : vector<16x1xf32> to vector<16x128xf32>
    %8 = arith.mulf %3, %7 : vector<16x128xf32>
    %cst = arith.constant dense<0.000000e+00> : vector<128xf32>
    %9 = vector.multi_reduction <add>, %6, %cst [0] : vector<16x128xf32> to vector<128xf32>
    %10 = vector.shape_cast %9 : vector<128xf32> to vector<1x128xf32>
    %cst_3 = arith.constant dense<0.000000e+00> : vector<128xf32>
    %11 = vector.multi_reduction <add>, %8, %cst_3 [0] : vector<16x128xf32> to vector<128xf32>
    %12 = vector.shape_cast %11 : vector<128xf32> to vector<1x128xf32>
    %13 = arith.mulf %6, %2 : vector<16x128xf32>
    %cst_4 = arith.constant dense<0.000000e+00> : vector<128xf32>
    %14 = vector.multi_reduction <add>, %13, %cst_4 [0] : vector<16x128xf32> to vector<128xf32>
    %15 = vector.shape_cast %14 : vector<128xf32> to vector<1x128xf32>
    %16 = arith.mulf %8, %3 : vector<16x128xf32>
    %cst_5 = arith.constant dense<0.000000e+00> : vector<128xf32>
    %17 = vector.multi_reduction <add>, %16, %cst_5 [0] : vector<16x128xf32> to vector<128xf32>
    %18 = vector.shape_cast %17 : vector<128xf32> to vector<1x128xf32>
    %19 = arith.mulf %6, %3 : vector<16x128xf32>
    %cst_6 = arith.constant dense<0.000000e+00> : vector<128xf32>
    %20 = vector.multi_reduction <add>, %19, %cst_6 [0] : vector<16x128xf32> to vector<128xf32>
    %21 = vector.shape_cast %20 : vector<128xf32> to vector<1x128xf32>
    %22 = arith.mulf %10, %10 : vector<1x128xf32>
    %23 = arith.mulf %12, %12 : vector<1x128xf32>
    %24 = arith.mulf %10, %12 : vector<1x128xf32>
    %25 = arith.subf %15, %22 : vector<1x128xf32>
    %26 = arith.subf %18, %23 : vector<1x128xf32>
    %27 = arith.subf %21, %24 : vector<1x128xf32>
    %cst_7 = arith.constant 2.000000e+00 : f32
    %28 = vector.broadcast %cst_7 : f32 to vector<1x128xf32>
    %29 = arith.mulf %28, %24 : vector<1x128xf32>
    %cst_8 = arith.constant 9.99999974E-5 : f32
    %30 = vector.broadcast %cst_8 : f32 to vector<1x128xf32>
    %31 = arith.addf %29, %30 : vector<1x128xf32>
    %cst_9 = arith.constant 2.000000e+00 : f32
    %32 = vector.broadcast %cst_9 : f32 to vector<1x128xf32>
    %33 = arith.mulf %32, %27 : vector<1x128xf32>
    %cst_10 = arith.constant 8.99999984E-4 : f32
    %34 = vector.broadcast %cst_10 : f32 to vector<1x128xf32>
    %35 = arith.addf %33, %34 : vector<1x128xf32>
    %36 = arith.mulf %31, %35 : vector<1x128xf32>
    %37 = arith.addf %22, %23 : vector<1x128xf32>
    %cst_11 = arith.constant 9.99999974E-5 : f32
    %38 = vector.broadcast %cst_11 : f32 to vector<1x128xf32>
    %39 = arith.addf %37, %38 : vector<1x128xf32>
    %40 = arith.addf %25, %26 : vector<1x128xf32>
    %cst_12 = arith.constant 8.99999984E-4 : f32
    %41 = vector.broadcast %cst_12 : f32 to vector<1x128xf32>
    %42 = arith.addf %40, %41 : vector<1x128xf32>
    %43 = arith.mulf %39, %42 : vector<1x128xf32>
    %44 = tpu.reciprocal %43 {approx = true} : vector<1x128xf32> -> vector<1x128xf32>
    %45 = arith.mulf %36, %44 : vector<1x128xf32>
    %46 = vector.shape_cast %45 : vector<1x128xf32> to vector<1x1x128xf32>
    %cst_13 = arith.constant dense<0.000000e+00> : vector<1xf32>
    %47 = vector.multi_reduction <add>, %46, %cst_13 [1, 2] : vector<1x1x128xf32> to vector<1xf32>
    %48 = vector.shape_cast %47 : vector<1xf32> to vector<1x1x1xf32>
    %49 = vector.extract %48[0, 0, 0] : f32 from vector<1x1x1xf32>
    %50 = vector.broadcast %49 : f32 to vector<1x1xf32>
    %51 = vector.shape_cast %50 : vector<1x1xf32> to vector<1x1xf32>
    %52 = vector.broadcast %51 : vector<1x1xf32> to vector<8x128xf32>
    %c0_14 = arith.constant 0 : index
    %c0_15 = arith.constant 0 : index
    %53 = vector.load %arg3[%c0_14, %c0_15] : memref<8x128xf32, #tpu.memory_space<vmem>>, vector<8x128xf32>
    tpu.vector_store %arg3[%c0_14, %c0_15], %52 {strides = array<i32>} : memref<8x128xf32, #tpu.memory_space<vmem>>, vector<8x128xf32>,
    return
  }
  func.func @transform_0(%arg0: i32) -> (i32, i32) {
    %c0_i32 = arith.constant 0 : i32
    %c0_i32_0 = arith.constant 0 : i32
    %c0_i32_1 = arith.constant 0 : i32
    return %c0_i32, %c0_i32_0 : i32, i32
  }
  func.func @transform_1(%arg0: i32) -> (i32, i32) {
    %c0_i32 = arith.constant 0 : i32
    %c0_i32_0 = arith.constant 0 : i32
    return %c0_i32, %arg0 : i32, i32
  }
  func.func @transform_2(%arg0: i32) -> (i32, i32) {
    %c0_i32 = arith.constant 0 : i32
    %c0_i32_0 = arith.constant 0 : i32
    return %arg0, %c0_i32 : i32, i32
  }
}

</mosaic_0001>

<bundles_post_ra>
// kernel: s3im_loss.1
= control target key start
LH: loop header
LB: loop body
LE: loop exit
PB: predicated region body
PF: predicated region fallthrough
CT: control target
= control target key end

     0   :  { %s442_s9 = smov 0   ;;  %s444_s10 = smov 0   ;;  %s502_s0 = inlined_call_operand.vmem [shape: f32[16,1], index: 0, kind: input, shape index: {}]   ;;  %s503_s1 = inlined_call_operand.vmem [shape: bf16[32,256], index: 1, kind: input, shape index: {}]   ;;  %s504_s2 = inlined_call_operand.vmem [shape: f32[16,128], index: 2, kind: output, shape index: {}]  }
   0x1   :  { %s446_s11 = smov 0  }
   0x2 LB: > { %s352_s12 = sadd.s32 4294967295, %s424_s11   ;;  %s459_s13 = sadd.s32 1, %s424_s11   ;;  %s424_s11 = sphi %s446_s11, %s507_s11   ;;  %s420_s10 = sphi %s444_s10, %s506_s10   ;;  %s416_s9 = sphi %s442_s9, %s505_s9  }
   0x3   : > { %s37_s14 = ssub.s32 %s424_s11, %s459_s13  ;;  %s40_s15 = sadd.s32 1, %s420_s10 }
   0x4   : > { %p38_p0 = scmp.eq.s32.totalorder %s37_s14, 0  ;;  %p47_p1 = scmp.ne.s32.totalorder %s420_s10, %s416_s9 }
   0x5   : > { %p48_p2 = scmp.eq.s32.totalorder %s424_s11, 0  ;;  %p355_p4 = scmp.ge.s32.totalorder %s424_s11, 2 }
   0x6   : > { %s468_s16 = scalar_select %p38_p0, %s420_s10, %s40_s15  }
   0x7   : > { %p49_p3 = por %p48_p2, %p47_p1  ;;  %102 = sbr.rel (%p355_p4) target bundleno = 20 (0x14), region = 20 }
   0xc   : > { %105 = sbr.rel (!%p49_p3) target bundleno = 20 (0x14), region = 24  ;;  %s107_s17 = sand.u32 (%p49_p3), 1, %s420_s10  }
   0xd   : > { %s357_s18 = sshll.u32 (%p49_p3), %s424_s11, 2  ;;  %s356_s19 = sshll.u32 (%p49_p3), %s107_s17, 4 }
   0xe   : > { %s111_s22 = scalar_lea.vmem (%p49_p3), %s503_s1, %s357_s18  ;;  %s109_s23 = scalar_lea.vmem (%p49_p3), [#allocation2], %s356_s19 }
   0xf   : > { %v128_v0 = vld [vmem:[%s111_s22] sm:$0xf] (%p49_p3)  ;;  %v130_v1 = vld [vmem:[%s111_s22 + $0x8] sm:$0xf] (%p49_p3)  ;;  %v132_v2 = vld [vmem:[%s111_s22 + $0x10] sm:$0xf] (%p49_p3) }
  0x10   : > { %129 = vst [vmem:[%s109_s23] sm:$0xf] (%p49_p3), %v128_v0  ;;  %v134_v3 = vld [vmem:[%s111_s22 + $0x18] sm:$0xf] (%p49_p3) }
  0x11   : > { %131 = vst [vmem:[%s109_s23 + $0x4] sm:$0xf] %v130_v1 }
  0x12   : > { %133 = vst [vmem:[%s109_s23 + $0x8] sm:$0xf] %v132_v2 }
  0x13   : > { %135 = vst [vmem:[%s109_s23 + $0xc] sm:$0xf] %v134_v3 }
  0x14 PF: > { %p358_p5 = scmp.ge.s32.totalorder %s424_s11, 1  ;;  %p166_p6 = scmp.lt.s32.totalorder %s424_s11, 3 }
  0x16   : > { %p167_p7 = pnand %p358_p5, %p166_p6 }
  0x17   : > { %s173_s28 = sand.u32 (!%p167_p7), 1, %s416_s9   ;;  %p193_p8 = scmp.lt.s32.totalorder (!%p167_p7), %s352_s12, 1 }
  0x18   : > { %170 = sbr.rel (%p167_p7) target bundleno = 370 (0x172), region = 65  ;;  %s359_s29 = sshll.u32 (!%p167_p7), %s173_s28, 4 }
  0x19   : > { %s175_s30 = scalar_lea.vmem (!%p167_p7), [#allocation2], %s359_s29 }
  0x1d   : > { %v205_v4 = vld [vmem:[%s502_s0] sm:$0xff]  ;;  %v426_v5 = vmov 0   ;;  %v206_v6 = vld [vmem:[%s502_s0 + $0x8] sm:$0xff]  ;;  %vm280_vm0 = vcmask 1040384   ;;  %s509_s12 = smov (!%p193_p8, %s352_s12), 1 }
  0x1e   : > { %399 = vset.pattern.permute.xlu0 %v426_v5  ;;  %v364_v7 = vld [vmem:[%s175_s30] sm:$0xff]   ;;  %v371_v8 = vld [vmem:[%s175_s30 + $0x8] sm:$0xff]   ;;  %s360_s3 = sshll.u32 %s509_s12, 3 }
  0x1f   : > { %209 = vperm.xlu0 %399, %v205_v4   ;;  %v365_v10 = vunpack.c.l.bf16 %v364_v7  ;;  %v369_v11 = vunpack.c.l.bf16 %v371_v8  ;;  %v366_v12 = vunpack.c.h.bf16 %v364_v7  ;;  %v370_v13 = vunpack.c.h.bf16 %v371_v8  ;;  %s196_s6 = scalar_lea.vmem %s504_s2, %s360_s3 }
  0x27   : > { %214 = vperm.xlu0 %399, %v206_v6  }
  0x91   : > { %v210_v9 = vpop.permute.xlu0 %209 }
  0x92   : > { %v217_v14 = vmul.f32 %v365_v10, %v210_v9  ;;  %v219_v15 = vmul.f32 %v369_v11, %v210_v9 }
  0x94   : > { %v235_v19 = vmul.f32 %v365_v10, %v217_v14  ;;  %v244_v20 = vmul.f32 %v369_v11, %v219_v15  ;;  %v253_v25 = vmul.f32 %v369_v11, %v217_v14 }
  0x99   : > { %v215_v16 = vpop.permute.xlu0 %214 }
  0x9a   : > { %v218_v17 = vmul.f32 %v366_v12, %v215_v16  ;;  %v220_v18 = vmul.f32 %v370_v13, %v215_v16 }
  0x9c   : > { %v221_v21 = vadd.f32 %v218_v17, %v217_v14  ;;  %v228_v22 = vadd.f32 %v220_v18, %v219_v15  ;;  %v236_v23 = vmul.f32 %v366_v12, %v218_v17  ;;  %v245_v24 = vmul.f32 %v370_v13, %v220_v18 }
  0x9d   : > { %v254_v26 = vmul.f32 %v370_v13, %v218_v17 }
  0x9e   : > { %v222_v27 = vrot.slane %v221_v21, 4  ;;  %v229_v28 = vrot.slane %v228_v22, 4  ;;  %v237_v29 = vadd.f32 %v236_v23, %v235_v19  ;;  %v246_v30 = vadd.f32 %v245_v24, %v244_v20 }
  0x9f   : > { %v255_v31 = vadd.f32 %v254_v26, %v253_v25 }
  0xa0   : > { %v223_v32 = vadd.f32 %v222_v27, %v221_v21  ;;  %v230_v33 = vadd.f32 %v229_v28, %v228_v22  ;;  %v238_v34 = vrot.slane %v237_v29, 4  ;;  %v247_v35 = vrot.slane %v246_v30, 4 }
  0xa1   : > { %v256_v36 = vrot.slane %v255_v31, 4 }
  0xa2   : > { %v224_v37 = vrot.slane %v223_v32, 2  ;;  %v231_v38 = vrot.slane %v230_v33, 2  ;;  %v239_v39 = vadd.f32 %v238_v34, %v237_v29  ;;  %v248_v40 = vadd.f32 %v247_v35, %v246_v30 }
  0xa3   : > { %v257_v41 = vadd.f32 %v256_v36, %v255_v31 }
  0xa4   : > { %v225_v42 = vadd.f32 %v224_v37, %v223_v32  ;;  %v232_v43 = vadd.f32 %v231_v38, %v230_v33  ;;  %v240_v44 = vrot.slane %v239_v39, 2  ;;  %v249_v45 = vrot.slane %v248_v40, 2 }
  0xa5   : > { %v258_v46 = vrot.slane %v257_v41, 2 }
  0xa6   : > { %v226_v47 = vrot.slane %v225_v42, 1  ;;  %v233_v48 = vrot.slane %v232_v43, 1  ;;  %v241_v49 = vadd.f32 %v240_v44, %v239_v39  ;;  %v250_v50 = vadd.f32 %v249_v45, %v248_v40 }
  0xa7   : > { %v259_v51 = vadd.f32 %v258_v46, %v257_v41 }
  0xa8   : > { %v234_v52 = vadd.f32 %v233_v48, %v232_v43  ;;  %v242_v53 = vrot.slane %v241_v49, 1  ;;  %v251_v54 = vrot.slane %v250_v50, 1  ;;  %v227_v55 = vadd.f32 %v226_v47, %v225_v42 }
  0xa9   : > { %v260_v56 = vrot.slane %v259_v51, 1 }
  0xaa   : > { %v243_v57 = vadd.f32 %v242_v53, %v241_v49  ;;  %v252_v58 = vadd.f32 %v251_v54, %v250_v50  ;;  %v263_v59 = vmul.f32 %v234_v52, %v234_v52  ;;  %v262_v60 = vmul.f32 %v227_v55, %v227_v55 }
  0xab   : > { %v261_v61 = vadd.f32 %v260_v56, %v259_v51  ;;  %v264_v62 = vmul.f32 %v234_v52, %v227_v55 }
  0xac   : > { %v266_v63 = vsub.f32 %v252_v58, %v263_v59  ;;  %v265_v0 = vsub.f32 %v243_v57, %v262_v60  ;;  %v273_v1 = vadd.f32 %v263_v59, %v262_v60 }
  0xad   : > { %v267_v2 = vsub.f32 %v261_v61, %v264_v62  ;;  %v268_v8 = vmul.f32 2.0, %v264_v62 }
  0xae   : > { %v275_v3 = vadd.f32 %v266_v63, %v265_v0  ;;  %v274_v4 = vadd.f32 0.0001, %v273_v1 }
  0xaf   : > { %v270_v6 = vmul.f32 2.0, %v267_v2  ;;  %v269_v10 = vadd.f32 0.0001, %v268_v8 }
  0xb0   : > { %v276_v5 = vadd.f32 0.0009, %v275_v3 }
  0xb1   : > { %v271_v9 = vadd.f32 0.0009, %v270_v6 }
  0xb2   : > { %v277_v7 = vmul.f32 %v276_v5, %v274_v4 }
  0xb3   : > { %v272_v11 = vmul.f32 %v271_v9, %v269_v10 }
  0xb4   : > { %400 = vrcp.f32 %v277_v7 }
  0xba   : > { %v401_v12 = vpop.eup %400 }
  0xbb   : > { %v279_v13 = vmul.f32 %v401_v12, %v272_v11 }
  0xbd   : > { %v281_v14 = vsel %vm280_vm0, %v279_v13, 0.0 }
  0xbe   : > { %282 = vadd.xlane.f32.xlu1 %v281_v14 }
 0x131   : > { %v283_v15 = vpop.xlane.xlu1 %282 }
 0x132   : > { %v284_v16 = vrot.slane %v283_v15, 4 }
 0x134   : > { %v285_v17 = vadd.f32 %v284_v16, %v283_v15 }
 0x136   : > { %v286_v18 = vrot.slane %v285_v17, 2 }
 0x138   : > { %v287_v19 = vadd.f32 %v286_v18, %v285_v17 }
 0x13a   : > { %v288_v20 = vrot.slane %v287_v19, 1 }
 0x13c   : > { %v289_v21 = vadd.f32 %v288_v20, %v287_v19 }
 0x13e   : > { %372 = vpush %v289_v21 }
 0x16f   : > { %s373_s7 = spop %372 }
 0x170   : > { %v291_v22 = vstv %s373_s7 }
 0x171   : > { %292 = vst [vmem:[%s196_s6] sm:$0xff] %v291_v22 }
 0x172 PF: > { %p9_p9 = scmp.ge.s32.totalorder %s459_s13, 4   ;;  %s505_s9 = smov %s420_s10 }
 0x173   : > { %s506_s10 = smov %s468_s16  ;;  %s507_s11 = smov %s459_s13 }
 0x174   :  { %11 = sbr.rel (!%p9_p9) target bundleno = 2 (0x2), region = 104 }

</bundles_post_ra>
